<compile_context>
chip_gen: v5e
topology: v5e:2x2
jax: 0.10.0
libtpu: 0.0.40
codegen_flags: <defaults>
</compile_context>

<pallas_src>
import jax
import jax.numpy as jnp
from jax.experimental import pallas as pl
from jax.experimental.pallas import tpu as pltpu


# ----------------------------- static layout --------------------------------

def vae_layout(input_dim, latent_dim, encoder_layers, decoder_layers):
    """Describes every Linear layer of the VAE and how it is packed into the
    two parameter slabs.  lin[i] = (d_in, d_out, has_norm)."""
    lin = []
    prev = input_dim
    for u in encoder_layers:                    # encoder hidden blocks
        lin.append((prev, u, True))
        prev = u
    lin.append((prev, 2 * latent_dim, False))   # fused z_mean | z_log_var head
    prev = latent_dim
    for u in decoder_layers:                    # decoder hidden blocks
        lin.append((prev, u, True))
        prev = u
    lin.append((prev, input_dim, False))        # decoder output projection

    lane_w = max(max(din, dout) for din, dout, _ in lin)  # slab lane width
    w_off, v_row = [], []
    r = vr = 0
    for din, dout, has_norm in lin:
        w_off.append(r)
        r += din
        v_row.append(vr)                        # bias row (+ gamma, beta rows)
        vr += 3 if has_norm else 1
    return dict(lin=lin, lane_w=lane_w, w_off=w_off, v_row=v_row,
                w_rows=r, v_rows=vr,
                n_enc=len(encoder_layers), n_dec=len(decoder_layers),
                latent_dim=latent_dim, input_dim=input_dim)


# ------------------------- params: init / packing ---------------------------

def init_params(key, layout):
    """Per-layer params in PyTorch nn.Linear style (weights stored (in, out))."""
    params = []
    keys = jax.random.split(key, len(layout["lin"]))
    for k, (din, dout, has_norm) in zip(keys, layout["lin"]):
        kw, kb = jax.random.split(k)
        bound = 1.0 / (din ** 0.5)
        w = jax.random.uniform(kw, (din, dout), jnp.float32, -bound, bound)
        b = jax.random.uniform(kb, (dout,), jnp.float32, -bound, bound)
        if has_norm:
            g = jnp.ones((dout,), jnp.float32)
            bt = jnp.zeros((dout,), jnp.float32)
        else:
            g = bt = None
        params.append((w, b, g, bt))
    return params


def pack_params(layout, params):
    """Pack all weights into one (w_rows, lane_w) slab and all bias/gamma/beta
    vectors into one (v_rows, lane_w) slab (zero padded)."""
    lane_w = layout["lane_w"]
    w_slab = jnp.zeros((layout["w_rows"], lane_w), jnp.float32)
    v_slab = jnp.zeros((layout["v_rows"], lane_w), jnp.float32)
    for (din, dout, has_norm), r0, vr, (w, b, g, bt) in zip(
            layout["lin"], layout["w_off"], layout["v_row"], params):
        w_slab = w_slab.at[r0:r0 + din, :dout].set(w)
        v_slab = v_slab.at[vr, :dout].set(b)
        if has_norm:
            v_slab = v_slab.at[vr + 1, :dout].set(g)
            v_slab = v_slab.at[vr + 2, :dout].set(bt)
    return w_slab, v_slab


# --------------------------- kernel + wrapper --------------------------------

def build_vae_forward(layout):
    lin = layout["lin"]
    w_off = layout["w_off"]
    v_row = layout["v_row"]
    n_enc = layout["n_enc"]
    n_dec = layout["n_dec"]
    L = layout["latent_dim"]
    D_in = layout["input_dim"]

    def kernel(x_ref, eps_ref, w_ref, v_ref, out_ref):
        # Load each packed slab exactly once (hoists all parameter reads).
        W = w_ref[...]   # (w_rows, lane_w) packed weights
        V = v_ref[...]   # (v_rows, lane_w) packed bias / gamma / beta

        def lrelu(h):  # nn.LeakyReLU default negative_slope = 0.01
            return jnp.where(h >= 0, h, 0.01 * h)

        def ln(h, g, b):  # nn.LayerNorm default eps = 1e-5
            mu = jnp.mean(h, axis=-1, keepdims=True)
            var = jnp.mean((h - mu) ** 2, axis=-1, keepdims=True)
            return (h - mu) * jax.lax.rsqrt(var + 1e-5) * g + b

        def linear(h, i):
            din, dout, _ = lin[i]
            r0, vr = w_off[i], v_row[i]
            w = W[r0:r0 + din, 0:dout]            # static slices: free views
            b = V[vr:vr + 1, 0:dout]
            return jnp.dot(h, w, preferred_element_type=jnp.float32) + b

        def hidden_block(h, i):                   # Linear->LeakyReLU->LN->(Dropout=id)
            _, dout, _ = lin[i]
            vr = v_row[i]
            g = V[vr + 1:vr + 2, 0:dout]
            bt = V[vr + 2:vr + 3, 0:dout]
            return ln(lrelu(linear(h, i)), g, bt)

        # ---- encoder hidden layers ----
        h = x_ref[...]
        li = 0
        for _ in range(n_enc):
            h = hidden_block(h, li)
            li += 1

        # ---- fused z_mean | z_log_var head + reparameterization ----
        zz = linear(h, li)
        li += 1
        z_mean = zz[:, 0:L]
        z_log_var = jnp.clip(zz[:, L:2 * L], -10.0, 10.0)
        z = z_mean + eps_ref[...] * jnp.exp(0.5 * z_log_var)

        # ---- decoder hidden layers + output projection ----
        d = z
        for _ in range(n_dec):
            d = hidden_block(d, li)
            li += 1
        x_recon = linear(d, li)

        # single merged output slab: [ x_recon | z_mean | z_log_var ]
        out_ref[:, 0:D_in] = x_recon
        out_ref[:, D_in:D_in + L] = z_mean
        out_ref[:, D_in + L:D_in + 2 * L] = z_log_var

    @jax.jit
    def forward(x, eps, w_slab, v_slab):
        B = x.shape[0]
        out = pl.pallas_call(
            kernel,
            out_shape=jax.ShapeDtypeStruct((B, D_in + 2 * L), jnp.float32),
            # gridless: whole problem in VMEM, single kernel invocation
            in_specs=[pl.BlockSpec(memory_space=pltpu.MemorySpace.VMEM)] * 4,
            out_specs=pl.BlockSpec(memory_space=pltpu.MemorySpace.VMEM),
        )(x, eps, w_slab, v_slab)
        return (out[:, :D_in],
                out[:, D_in:D_in + L],
                out[:, D_in + L:])

    return forward


# --------------------------- pure-JAX reference ------------------------------

def vae_reference(x, eps, layout, params):
    def lrelu(h):
        return jnp.where(h >= 0, h, 0.01 * h)

    def ln(h, g, b):
        mu = jnp.mean(h, -1, keepdims=True)
        var = jnp.mean((h - mu) ** 2, -1, keepdims=True)
        return (h - mu) * jax.lax.rsqrt(var + 1e-5) * g + b

    L = layout["latent_dim"]
    it = iter(params)
    h = x
    for _ in range(layout["n_enc"]):
        w, b, g, bt = next(it)
        h = ln(lrelu(h @ w + b), g, bt)
    w, b, _, _ = next(it)
    zz = h @ w + b
    z_mean, z_log_var = zz[:, :L], jnp.clip(zz[:, L:], -10.0, 10.0)
    z = z_mean + eps * jnp.exp(0.5 * z_log_var)
    d = z
    for _ in range(layout["n_dec"]):
        w, b, g, bt = next(it)
        d = ln(lrelu(d @ w + b), g, bt)
    w, b, _, _ = next(it)
    return d @ w + b, z_mean, z_log_var


# --------------------------------- main --------------------------------------

if __name__ == "__main__":
    B = 8
    input_dim = 16
    latent_dim = 8
    encoder_layers = [32, 16]
    decoder_layers = [16, 32]
    # dropout_rate unused in eval-mode forward; use_batchnorm=False -> LayerNorm.

    layout = vae_layout(input_dim, latent_dim, encoder_layers, decoder_layers)
    forward = build_vae_forward(layout)

    root = jax.random.PRNGKey(0)
    k_param, k_x, k_eps = jax.random.split(root, 3)

    params = init_params(k_param, layout)
    w_slab, v_slab = pack_params(layout, params)

    x = jax.random.normal(k_x, (B, input_dim), jnp.float32)
    # TODO(synk): torch.randn_like(std) has no in-kernel equivalent here; eps is
    # drawn in plain JAX and passed in (same reparameterization semantics).
    eps = jax.random.normal(k_eps, (B, latent_dim), jnp.float32)

    x_recon, z_mean, z_log_var = forward(x, eps, w_slab, v_slab)
    jax.block_until_ready((x_recon, z_mean, z_log_var))

    # Correctness check against a plain-JAX reference on the unpacked params.
    xr_ref, zm_ref, zlv_ref = vae_reference(x, eps, layout, params)
    assert jnp.allclose(x_recon, xr_ref, atol=1e-2, rtol=1e-2)
    assert jnp.allclose(z_mean, zm_ref, atol=1e-2, rtol=1e-2)
    assert jnp.allclose(z_log_var, zlv_ref, atol=1e-2, rtol=1e-2)

    print("KERNEL_OK")
</pallas_src>

<mosaic_0001>
module attributes {stable_mosaic.version = 11 : i64} {
  func.func @kernel(%arg0: memref<8x16xf32, #tpu.memory_space<vmem>>, %arg1: memref<8x8xf32, #tpu.memory_space<vmem>>, %arg2: memref<120x32xf32, #tpu.memory_space<vmem>>, %arg3: memref<14x32xf32, #tpu.memory_space<vmem>>, %arg4: memref<8x32xf32, #tpu.memory_space<vmem>>) attributes {dimension_semantics = [], scalar_prefetch = 0 : i64, scratch_operands = 0 : i64, tpu.core_type = #tpu.core_type<tc>} {
    %c0 = arith.constant 0 : index
    %c0_0 = arith.constant 0 : index
    %0 = vector.load %arg2[%c0, %c0_0] : memref<120x32xf32, #tpu.memory_space<vmem>>, vector<120x32xf32>
    %c0_1 = arith.constant 0 : index
    %c0_2 = arith.constant 0 : index
    %1 = vector.load %arg3[%c0_1, %c0_2] : memref<14x32xf32, #tpu.memory_space<vmem>>, vector<14x32xf32>
    %c0_3 = arith.constant 0 : index
    %c0_4 = arith.constant 0 : index
    %2 = vector.load %arg0[%c0_3, %c0_4] : memref<8x16xf32, #tpu.memory_space<vmem>>, vector<8x16xf32>
    %3 = vector.extract_strided_slice %1 {offsets = [1, 0], sizes = [1, 32], strides = [1, 1]} : vector<14x32xf32> to vector<1x32xf32>
    %4 = vector.extract_strided_slice %1 {offsets = [2, 0], sizes = [1, 32], strides = [1, 1]} : vector<14x32xf32> to vector<1x32xf32>
    %5 = vector.extract_strided_slice %0 {offsets = [0, 0], sizes = [16, 32], strides = [1, 1]} : vector<120x32xf32> to vector<16x32xf32>
    %6 = vector.extract_strided_slice %1 {offsets = [0, 0], sizes = [1, 32], strides = [1, 1]} : vector<14x32xf32> to vector<1x32xf32>
    %cst = arith.constant dense<0.000000e+00> : vector<8x32xf32>
    %7 = tpu.matmul %2, %5, %cst {dimension_numbers = #tpu.dot_dimension_numbers<[1], [0], [0], [1], [0, 0, 1, 1], [], []>} : vector<8x16xf32>, vector<16x32xf32>, vector<8x32xf32> -> vector<8x32xf32>
    %8 = vector.broadcast %6 : vector<1x32xf32> to vector<8x32xf32>
    %9 = arith.addf %7, %8 : vector<8x32xf32>
    %cst_5 = arith.constant 0.000000e+00 : f32
    %10 = vector.broadcast %cst_5 : f32 to vector<8x32xf32>
    %11 = arith.cmpf oge, %9, %10 : vector<8x32xf32>
    %cst_6 = arith.constant 0.00999999977 : f32
    %12 = vector.broadcast %cst_6 : f32 to vector<8x32xf32>
    %13 = arith.mulf %12, %9 : vector<8x32xf32>
    %14 = arith.select %11, %9, %13 : vector<8x32xi1>, vector<8x32xf32>
    %cst_7 = arith.constant dense<0.000000e+00> : vector<8xf32>
    %15 = vector.multi_reduction <add>, %14, %cst_7 [1] : vector<8x32xf32> to vector<8xf32>
    %16 = vector.shape_cast %15 : vector<8xf32> to vector<8x1xf32>
    %cst_8 = arith.constant 3.200000e+01 : f32
    %17 = vector.broadcast %cst_8 : f32 to vector<8x1xf32>
    %18 = arith.divf %16, %17 : vector<8x1xf32>
    %19 = vector.broadcast %18 : vector<8x1xf32> to vector<8x32xf32>
    %20 = arith.subf %14, %19 : vector<8x32xf32>
    %21 = arith.mulf %20, %20 : vector<8x32xf32>
    %cst_9 = arith.constant dense<0.000000e+00> : vector<8xf32>
    %22 = vector.multi_reduction <add>, %21, %cst_9 [1] : vector<8x32xf32> to vector<8xf32>
    %23 = vector.shape_cast %22 : vector<8xf32> to vector<8x1xf32>
    %cst_10 = arith.constant 3.200000e+01 : f32
    %24 = vector.broadcast %cst_10 : f32 to vector<8x1xf32>
    %25 = arith.divf %23, %24 : vector<8x1xf32>
    %26 = vector.broadcast %18 : vector<8x1xf32> to vector<8x32xf32>
    %27 = arith.subf %14, %26 : vector<8x32xf32>
    %cst_11 = arith.constant 9.99999974E-6 : f32
    %28 = vector.broadcast %cst_11 : f32 to vector<8x1xf32>
    %29 = arith.addf %25, %28 : vector<8x1xf32>
    %30 = math.rsqrt %29 : vector<8x1xf32>
    %31 = vector.broadcast %30 : vector<8x1xf32> to vector<8x32xf32>
    %32 = arith.mulf %27, %31 : vector<8x32xf32>
    %33 = vector.broadcast %3 : vector<1x32xf32> to vector<8x32xf32>
    %34 = arith.mulf %32, %33 : vector<8x32xf32>
    %35 = vector.broadcast %4 : vector<1x32xf32> to vector<8x32xf32>
    %36 = arith.addf %34, %35 : vector<8x32xf32>
    %37 = vector.extract_strided_slice %1 {offsets = [4, 0], sizes = [1, 16], strides = [1, 1]} : vector<14x32xf32> to vector<1x16xf32>
    %38 = vector.extract_strided_slice %1 {offsets = [5, 0], sizes = [1, 16], strides = [1, 1]} : vector<14x32xf32> to vector<1x16xf32>
    %39 = vector.extract_strided_slice %0 {offsets = [16, 0], sizes = [32, 16], strides = [1, 1]} : vector<120x32xf32> to vector<32x16xf32>
    %40 = vector.extract_strided_slice %1 {offsets = [3, 0], sizes = [1, 16], strides = [1, 1]} : vector<14x32xf32> to vector<1x16xf32>
    %cst_12 = arith.constant dense<0.000000e+00> : vector<8x16xf32>
    %41 = tpu.matmul %36, %39, %cst_12 {dimension_numbers = #tpu.dot_dimension_numbers<[1], [0], [0], [1], [0, 0, 1, 1], [], []>} : vector<8x32xf32>, vector<32x16xf32>, vector<8x16xf32> -> vector<8x16xf32>
    %42 = vector.broadcast %40 : vector<1x16xf32> to vector<8x16xf32>
    %43 = arith.addf %41, %42 : vector<8x16xf32>
    %cst_13 = arith.constant 0.000000e+00 : f32
    %44 = vector.broadcast %cst_13 : f32 to vector<8x16xf32>
    %45 = arith.cmpf oge, %43, %44 : vector<8x16xf32>
    %cst_14 = arith.constant 0.00999999977 : f32
    %46 = vector.broadcast %cst_14 : f32 to vector<8x16xf32>
    %47 = arith.mulf %46, %43 : vector<8x16xf32>
    %48 = arith.select %45, %43, %47 : vector<8x16xi1>, vector<8x16xf32>
    %cst_15 = arith.constant dense<0.000000e+00> : vector<8xf32>
    %49 = vector.multi_reduction <add>, %48, %cst_15 [1] : vector<8x16xf32> to vector<8xf32>
    %50 = vector.shape_cast %49 : vector<8xf32> to vector<8x1xf32>
    %cst_16 = arith.constant 1.600000e+01 : f32
    %51 = vector.broadcast %cst_16 : f32 to vector<8x1xf32>
    %52 = arith.divf %50, %51 : vector<8x1xf32>
    %53 = vector.broadcast %52 : vector<8x1xf32> to vector<8x16xf32>
    %54 = arith.subf %48, %53 : vector<8x16xf32>
    %55 = arith.mulf %54, %54 : vector<8x16xf32>
    %cst_17 = arith.constant dense<0.000000e+00> : vector<8xf32>
    %56 = vector.multi_reduction <add>, %55, %cst_17 [1] : vector<8x16xf32> to vector<8xf32>
    %57 = vector.shape_cast %56 : vector<8xf32> to vector<8x1xf32>
    %cst_18 = arith.constant 1.600000e+01 : f32
    %58 = vector.broadcast %cst_18 : f32 to vector<8x1xf32>
    %59 = arith.divf %57, %58 : vector<8x1xf32>
    %60 = vector.broadcast %52 : vector<8x1xf32> to vector<8x16xf32>
    %61 = arith.subf %48, %60 : vector<8x16xf32>
    %cst_19 = arith.constant 9.99999974E-6 : f32
    %62 = vector.broadcast %cst_19 : f32 to vector<8x1xf32>
    %63 = arith.addf %59, %62 : vector<8x1xf32>
    %64 = math.rsqrt %63 : vector<8x1xf32>
    %65 = vector.broadcast %64 : vector<8x1xf32> to vector<8x16xf32>
    %66 = arith.mulf %61, %65 : vector<8x16xf32>
    %67 = vector.broadcast %37 : vector<1x16xf32> to vector<8x16xf32>
    %68 = arith.mulf %66, %67 : vector<8x16xf32>
    %69 = vector.broadcast %38 : vector<1x16xf32> to vector<8x16xf32>
    %70 = arith.addf %68, %69 : vector<8x16xf32>
    %71 = vector.extract_strided_slice %0 {offsets = [48, 0], sizes = [16, 16], strides = [1, 1]} : vector<120x32xf32> to vector<16x16xf32>
    %72 = vector.extract_strided_slice %1 {offsets = [6, 0], sizes = [1, 16], strides = [1, 1]} : vector<14x32xf32> to vector<1x16xf32>
    %cst_20 = arith.constant dense<0.000000e+00> : vector<8x16xf32>
    %73 = tpu.matmul %70, %71, %cst_20 {dimension_numbers = #tpu.dot_dimension_numbers<[1], [0], [0], [1], [0, 0, 1, 1], [], []>} : vector<8x16xf32>, vector<16x16xf32>, vector<8x16xf32> -> vector<8x16xf32>
    %74 = vector.broadcast %72 : vector<1x16xf32> to vector<8x16xf32>
    %75 = arith.addf %73, %74 : vector<8x16xf32>
    %76 = vector.extract_strided_slice %75 {offsets = [0, 0], sizes = [8, 8], strides = [1, 1]} : vector<8x16xf32> to vector<8x8xf32>
    %77 = vector.extract_strided_slice %75 {offsets = [0, 8], sizes = [8, 8], strides = [1, 1]} : vector<8x16xf32> to vector<8x8xf32>
    %cst_21 = arith.constant -1.000000e+01 : f32
    %cst_22 = arith.constant 1.000000e+01 : f32
    %78 = vector.broadcast %cst_21 : f32 to vector<8x8xf32>
    %79 = arith.maximumf %78, %77 : vector<8x8xf32>
    %80 = vector.broadcast %cst_22 : f32 to vector<8x8xf32>
    %81 = arith.minimumf %80, %79 : vector<8x8xf32>
    %c0_23 = arith.constant 0 : index
    %c0_24 = arith.constant 0 : index
    %82 = vector.load %arg1[%c0_23, %c0_24] : memref<8x8xf32, #tpu.memory_space<vmem>>, vector<8x8xf32>
    %cst_25 = arith.constant 5.000000e-01 : f32
    %83 = vector.broadcast %cst_25 : f32 to vector<8x8xf32>
    %84 = arith.mulf %83, %81 : vector<8x8xf32>
    %85 = math.exp %84 : vector<8x8xf32>
    %86 = arith.mulf %82, %85 : vector<8x8xf32>
    %87 = arith.addf %76, %86 : vector<8x8xf32>
    %88 = vector.extract_strided_slice %1 {offsets = [8, 0], sizes = [1, 16], strides = [1, 1]} : vector<14x32xf32> to vector<1x16xf32>
    %89 = vector.extract_strided_slice %1 {offsets = [9, 0], sizes = [1, 16], strides = [1, 1]} : vector<14x32xf32> to vector<1x16xf32>
    %90 = vector.extract_strided_slice %0 {offsets = [64, 0], sizes = [8, 16], strides = [1, 1]} : vector<120x32xf32> to vector<8x16xf32>
    %91 = vector.extract_strided_slice %1 {offsets = [7, 0], sizes = [1, 16], strides = [1, 1]} : vector<14x32xf32> to vector<1x16xf32>
    %cst_26 = arith.constant dense<0.000000e+00> : vector<8x16xf32>
    %92 = tpu.matmul %87, %90, %cst_26 {dimension_numbers = #tpu.dot_dimension_numbers<[1], [0], [0], [1], [0, 0, 1, 1], [], []>} : vector<8x8xf32>, vector<8x16xf32>, vector<8x16xf32> -> vector<8x16xf32>
    %93 = vector.broadcast %91 : vector<1x16xf32> to vector<8x16xf32>
    %94 = arith.addf %92, %93 : vector<8x16xf32>
    %cst_27 = arith.constant 0.000000e+00 : f32
    %95 = vector.broadcast %cst_27 : f32 to vector<8x16xf32>
    %96 = arith.cmpf oge, %94, %95 : vector<8x16xf32>
    %cst_28 = arith.constant 0.00999999977 : f32
    %97 = vector.broadcast %cst_28 : f32 to vector<8x16xf32>
    %98 = arith.mulf %97, %94 : vector<8x16xf32>
    %99 = arith.select %96, %94, %98 : vector<8x16xi1>, vector<8x16xf32>
    %cst_29 = arith.constant dense<0.000000e+00> : vector<8xf32>
    %100 = vector.multi_reduction <add>, %99, %cst_29 [1] : vector<8x16xf32> to vector<8xf32>
    %101 = vector.shape_cast %100 : vector<8xf32> to vector<8x1xf32>
    %cst_30 = arith.constant 1.600000e+01 : f32
    %102 = vector.broadcast %cst_30 : f32 to vector<8x1xf32>
    %103 = arith.divf %101, %102 : vector<8x1xf32>
    %104 = vector.broadcast %103 : vector<8x1xf32> to vector<8x16xf32>
    %105 = arith.subf %99, %104 : vector<8x16xf32>
    %106 = arith.mulf %105, %105 : vector<8x16xf32>
    %cst_31 = arith.constant dense<0.000000e+00> : vector<8xf32>
    %107 = vector.multi_reduction <add>, %106, %cst_31 [1] : vector<8x16xf32> to vector<8xf32>
    %108 = vector.shape_cast %107 : vector<8xf32> to vector<8x1xf32>
    %cst_32 = arith.constant 1.600000e+01 : f32
    %109 = vector.broadcast %cst_32 : f32 to vector<8x1xf32>
    %110 = arith.divf %108, %109 : vector<8x1xf32>
    %111 = vector.broadcast %103 : vector<8x1xf32> to vector<8x16xf32>
    %112 = arith.subf %99, %111 : vector<8x16xf32>
    %cst_33 = arith.constant 9.99999974E-6 : f32
    %113 = vector.broadcast %cst_33 : f32 to vector<8x1xf32>
    %114 = arith.addf %110, %113 : vector<8x1xf32>
    %115 = math.rsqrt %114 : vector<8x1xf32>
    %116 = vector.broadcast %115 : vector<8x1xf32> to vector<8x16xf32>
    %117 = arith.mulf %112, %116 : vector<8x16xf32>
    %118 = vector.broadcast %88 : vector<1x16xf32> to vector<8x16xf32>
    %119 = arith.mulf %117, %118 : vector<8x16xf32>
    %120 = vector.broadcast %89 : vector<1x16xf32> to vector<8x16xf32>
    %121 = arith.addf %119, %120 : vector<8x16xf32>
    %122 = vector.extract_strided_slice %1 {offsets = [11, 0], sizes = [1, 32], strides = [1, 1]} : vector<14x32xf32> to vector<1x32xf32>
    %123 = vector.extract_strided_slice %1 {offsets = [12, 0], sizes = [1, 32], strides = [1, 1]} : vector<14x32xf32> to vector<1x32xf32>
    %124 = vector.extract_strided_slice %0 {offsets = [72, 0], sizes = [16, 32], strides = [1, 1]} : vector<120x32xf32> to vector<16x32xf32>
    %125 = vector.extract_strided_slice %1 {offsets = [10, 0], sizes = [1, 32], strides = [1, 1]} : vector<14x32xf32> to vector<1x32xf32>
    %cst_34 = arith.constant dense<0.000000e+00> : vector<8x32xf32>
    %126 = tpu.matmul %121, %124, %cst_34 {dimension_numbers = #tpu.dot_dimension_numbers<[1], [0], [0], [1], [0, 0, 1, 1], [], []>} : vector<8x16xf32>, vector<16x32xf32>, vector<8x32xf32> -> vector<8x32xf32>
    %127 = vector.broadcast %125 : vector<1x32xf32> to vector<8x32xf32>
    %128 = arith.addf %126, %127 : vector<8x32xf32>
    %cst_35 = arith.constant 0.000000e+00 : f32
    %129 = vector.broadcast %cst_35 : f32 to vector<8x32xf32>
    %130 = arith.cmpf oge, %128, %129 : vector<8x32xf32>
    %cst_36 = arith.constant 0.00999999977 : f32
    %131 = vector.broadcast %cst_36 : f32 to vector<8x32xf32>
    %132 = arith.mulf %131, %128 : vector<8x32xf32>
    %133 = arith.select %130, %128, %132 : vector<8x32xi1>, vector<8x32xf32>
    %cst_37 = arith.constant dense<0.000000e+00> : vector<8xf32>
    %134 = vector.multi_reduction <add>, %133, %cst_37 [1] : vector<8x32xf32> to vector<8xf32>
    %135 = vector.shape_cast %134 : vector<8xf32> to vector<8x1xf32>
    %cst_38 = arith.constant 3.200000e+01 : f32
    %136 = vector.broadcast %cst_38 : f32 to vector<8x1xf32>
    %137 = arith.divf %135, %136 : vector<8x1xf32>
    %138 = vector.broadcast %137 : vector<8x1xf32> to vector<8x32xf32>
    %139 = arith.subf %133, %138 : vector<8x32xf32>
    %140 = arith.mulf %139, %139 : vector<8x32xf32>
    %cst_39 = arith.constant dense<0.000000e+00> : vector<8xf32>
    %141 = vector.multi_reduction <add>, %140, %cst_39 [1] : vector<8x32xf32> to vector<8xf32>
    %142 = vector.shape_cast %141 : vector<8xf32> to vector<8x1xf32>
    %cst_40 = arith.constant 3.200000e+01 : f32
    %143 = vector.broadcast %cst_40 : f32 to vector<8x1xf32>
    %144 = arith.divf %142, %143 : vector<8x1xf32>
    %145 = vector.broadcast %137 : vector<8x1xf32> to vector<8x32xf32>
    %146 = arith.subf %133, %145 : vector<8x32xf32>
    %cst_41 = arith.constant 9.99999974E-6 : f32
    %147 = vector.broadcast %cst_41 : f32 to vector<8x1xf32>
    %148 = arith.addf %144, %147 : vector<8x1xf32>
    %149 = math.rsqrt %148 : vector<8x1xf32>
    %150 = vector.broadcast %149 : vector<8x1xf32> to vector<8x32xf32>
    %151 = arith.mulf %146, %150 : vector<8x32xf32>
    %152 = vector.broadcast %122 : vector<1x32xf32> to vector<8x32xf32>
    %153 = arith.mulf %151, %152 : vector<8x32xf32>
    %154 = vector.broadcast %123 : vector<1x32xf32> to vector<8x32xf32>
    %155 = arith.addf %153, %154 : vector<8x32xf32>
    %156 = vector.extract_strided_slice %0 {offsets = [88, 0], sizes = [32, 16], strides = [1, 1]} : vector<120x32xf32> to vector<32x16xf32>
    %157 = vector.extract_strided_slice %1 {offsets = [13, 0], sizes = [1, 16], strides = [1, 1]} : vector<14x32xf32> to vector<1x16xf32>
    %cst_42 = arith.constant dense<0.000000e+00> : vector<8x16xf32>
    %158 = tpu.matmul %155, %156, %cst_42 {dimension_numbers = #tpu.dot_dimension_numbers<[1], [0], [0], [1], [0, 0, 1, 1], [], []>} : vector<8x32xf32>, vector<32x16xf32>, vector<8x16xf32> -> vector<8x16xf32>
    %159 = vector.broadcast %157 : vector<1x16xf32> to vector<8x16xf32>
    %160 = arith.addf %158, %159 : vector<8x16xf32>
    %c0_43 = arith.constant 0 : index
    %c0_44 = arith.constant 0 : index
    %161 = vector.load %arg4[%c0_43, %c0_44] : memref<8x32xf32, #tpu.memory_space<vmem>>, vector<8x16xf32>
    tpu.vector_store %arg4[%c0_43, %c0_44], %160 {strides = array<i32>} : memref<8x32xf32, #tpu.memory_space<vmem>>, vector<8x16xf32>,
    %c0_45 = arith.constant 0 : index
    %c16 = arith.constant 16 : index
    %162 = vector.load %arg4[%c0_45, %c16] : memref<8x32xf32, #tpu.memory_space<vmem>>, vector<8x8xf32>
    tpu.vector_store %arg4[%c0_45, %c16], %76 {strides = array<i32>} : memref<8x32xf32, #tpu.memory_space<vmem>>, vector<8x8xf32>,
    %c0_46 = arith.constant 0 : index
    %c24 = arith.constant 24 : index
    %163 = vector.load %arg4[%c0_46, %c24] : memref<8x32xf32, #tpu.memory_space<vmem>>, vector<8x8xf32>
    tpu.vector_store %arg4[%c0_46, %c24], %81 {strides = array<i32>} : memref<8x32xf32, #tpu.memory_space<vmem>>, vector<8x8xf32>,
    return
  }
}

</mosaic_0001>

<bundles_post_ra>
// kernel: forward.1
= control target key start
LH: loop header
LB: loop body
LE: loop exit
PB: predicated region body
PF: predicated region fallthrough
CT: control target
= control target key end

     0   :  { %vm36_vm0 = vcmask 130048   ;;  %vm63_vm2 = vcmask 261120   ;;  %v366_v10 = vmov 32.0   ;;  %v367_v47 = vmov 16.0   ;;  %s368_s8 = smov 120   ;;  %s506_s2 = inlined_call_operand.vmem [shape: f32[120,32], index: 2, kind: input, shape index: {}]   ;;  %s507_s0 = inlined_call_operand.vmem [shape: f32[8,16], index: 0, kind: input, shape index: {}]   ;;  %s508_s3 = inlined_call_operand.vmem [shape: f32[14,32], index: 3, kind: input, shape index: {}]   ;;  %s509_s1 = inlined_call_operand.vmem [shape: f32[8,8], index: 1, kind: input, shape index: {}]   ;;  %s510_s4 = inlined_call_operand.vmem [shape: f32[8,32], index: 4, kind: output, shape index: {}]  }
   0x1   :  { %v18_v0 = vld [vmem:[%s506_s2 + $0x8] sm:$0xff]  ;;  %v17_v1 = vld [vmem:[%s506_s2] sm:$0xff]  ;;  %352 = vrcp.f32 %v366_v10  ;;  %v20_v24 = vld [vmem:[%s506_s2 + $0x18] sm:$0xff]  ;;  %vm194_vm12 = vcmask 64512  }
   0x2   :  { %54 = vmatpush.msra.mxu0 %v18_v0  ;;  %v34_v2 = vld [vmem:[%s507_s0] sm:$0xff]  ;;  %v22_v22 = vld [vmem:[%s506_s2 + $0x28] sm:$0xff]  ;;  %v19_v25 = vld [vmem:[%s506_s2 + $0x10] sm:$0xff] }
   0x3   :  { %v408_v3 = vld [vmem:[%s508_s3] sm:$0xff]  ;;  %113 = vmatpush.msra.mxu1 %v22_v22  ;;  %v24_v59 = vld [vmem:[%s506_s2 + $0x38] sm:$0xff]  ;;  %v23_v60 = vld [vmem:[%s506_s2 + $0x30] sm:$0xff] }
   0x4   :  { %55 = vmatpush.msra.mxu0 %v17_v1  ;;  %v35_v4 = vperm.slane %v408_v3, 0  ;;  %v21_v23 = vld [vmem:[%s506_s2 + $0x20] sm:$0xff]  ;;  %v93_v35 = vperm.slane %v408_v3, 1  ;;  %v95_v38 = vperm.slane %v408_v3, 2  ;;  %v97_v41 = vperm.slane %v408_v3, 3  ;;  %175 = vmatpush.msra.mxu2 %v24_v59 }
   0x5   :  { %341 = vmatmul.msk.f32.vlgmr.msra.gmra.mxu0 %vm36_vm0, %v34_v2  ;;  %114 = vmatpush.msra.mxu1 %v21_v23  ;;  %v155_v10 = vperm.slane %v408_v3, 5  ;;  %v183_v22 = vld [vmem:[%s509_s1] sm:$0xff] }
   0x6   :  { %176 = vmatpush.msra.mxu2 %v23_v60 }
   0x7   :  { %v353_v11 = vpop.eup %352  ;;  %115 = vmatpush.msra.mxu1 %v20_v24 }
   0x8   :  { %v68_v12 = vmul.f32 32.0, %v353_v11  ;;  %vm72_vm3 = vweird.f32 %v353_v11 }
   0x9   :  { %116 = vmatpush.msra.mxu1 %v19_v25 }
   0xa   :  { %v69_v13 = vsub.f32 1.0, %v68_v12 }
   0xc   :  { %v70_v14 = vmul.f32 %v353_v11, %v69_v13  ;;  %v157_v13 = vperm.slane %v408_v3, 6 }
   0xe   :  { %v71_v15 = vadd.f32 %v353_v11, %v70_v14 }
  0x10   :  { %v412_v16 = vsel %vm72_vm3, %v353_v11, %v71_v15 }
  0x82   :  { %v57_v5 = vpop.f32.mrf.mxu0 }
  0x83   :  { %v58_v6 = vadd.f32 %v57_v5, %v35_v4 }
  0x85   :  { %v61_v7 = vmul.f32 0.01, %v58_v6  ;;  %vm60_vm1 = vcmp.ge.f32.partialorder %v58_v6, 0.0 }
  0x87   :  { %v62_v8 = vsel %vm60_vm1, %v58_v6, %v61_v7  ;;  %v153_v7 = vperm.slane %v408_v3, 4 }
  0x88   :  { %v64_v9 = vsel %vm63_vm2, %v62_v8, 0.0 }
  0x89   :  { %65 = vadd.xlane.f32.xlu0 %v64_v9 }
  0xfc   :  { %v66_v17 = vpop.xlane.xlu0 %65 }
  0xfd   :  { %v74_v18 = vmul.f32 %v412_v16, %v66_v17 }
  0xff   :  { %v75_v19 = vsub.f32 %v62_v8, %v74_v18 }
 0x101   :  { %v76_v20 = vmul.f32 %v75_v19, %v75_v19 }
 0x103   :  { %v77_v21 = vsel %vm63_vm2, %v76_v20, 0.0 }
 0x104   :  { %78 = vadd.xlane.f32.xlu0 %v77_v21  ;;  %v25_v21 = vld [vmem:[%s506_s2 + $0x40] sm:$0xff] }
 0x105   :  { %213 = vmatpush.msra.mxu3 %v25_v21 }
 0x177   :  { %v79_v26 = vpop.xlane.xlu0 %78 }
 0x178   :  { %v80_v27 = vmul.f32 %v79_v26, %v412_v16  ;;  %v193_v26 = vperm.slane %v408_v3, 7  ;;  %v27_v3 = vld [vmem:[%s506_s2 + $0x50] sm:$0xff] }
 0x179   :  { %265 = vmatpush.msrb.mxu3 %v27_v3 }
 0x17a   :  { %v81_v28 = vadd.f32 1e-05, %v80_v27 }
 0x17c   :  { %354 = vrsqrt.f32 %v81_v28  ;;  %vm88_vm5 = vweird.f32 %v81_v28 }
 0x17d   :  { %356 = vrcp.f32 %v367_v47 }
 0x182   :  { %v355_v29 = vpop.eup %354 }
 0x183   :  { %v83_v30 = vmul.f32 %v355_v29, %v81_v28  ;;  %vm89_vm4 = vweird.f32 %v355_v29  ;;  %v357_v48 = vpop.eup %356 }
 0x184   :  { %vm90_vm6 = vmor %vm88_vm5, %vm89_vm4  ;;  %v128_v49 = vmul.f32 16.0, %v357_v48  ;;  %vm132_vm8 = vweird.f32 %v357_v48 }
 0x185   :  { %v84_v31 = vmul.f32 %v355_v29, %v83_v30 }
 0x186   :  { %v129_v50 = vsub.f32 1.0, %v128_v49 }
 0x187   :  { %v85_v32 = vmul.f32 0.5, %v84_v31 }
 0x188   :  { %v130_v51 = vmul.f32 %v357_v48, %v129_v50 }
 0x189   :  { %v86_v33 = vsub.f32 1.5, %v85_v32 }
 0x18a   :  { %v131_v52 = vadd.f32 %v357_v48, %v130_v51 }
 0x18b   :  { %v87_v34 = vmul.f32 %v355_v29, %v86_v33 }
 0x18c   :  { %v434_v53 = vsel %vm132_vm8, %v357_v48, %v131_v52  ;;  %vm335_vm8 = vcmask 261312  }
 0x18d   :  { %v91_v36 = vsel %vm90_vm6, %v355_v29, %v87_v34 }
 0x18e   :  { %v92_v37 = vmul.f32 %v91_v36, %v75_v19 }
 0x190   :  { %v94_v39 = vmul.f32 %v93_v35, %v92_v37  ;;  %v26_v37 = vld [vmem:[%s506_s2 + $0x48] sm:$0xff] }
 0x191   :  { %266 = vmatpush.msrb.mxu3 %v26_v37 }
 0x192   :  { %v96_v40 = vadd.f32 %v95_v38, %v94_v39 }
 0x194   :  { %342 = vmatmul.msk.f32.vlgmr.msra.gmra.mxu1 %vm63_vm2, %v96_v40 }
 0x211   :  { %v118_v42 = vpop.f32.mrf.mxu1 }
 0x212   :  { %v119_v43 = vadd.f32 %v118_v42, %v97_v41 }
 0x214   :  { %v122_v44 = vmul.f32 0.01, %v119_v43  ;;  %vm121_vm7 = vcmp.ge.f32.partialorder %v119_v43, 0.0 }
 0x216   :  { %v123_v45 = vsel %vm121_vm7, %v119_v43, %v122_v44  ;;  %vm329_vm7 = vcmask 195712  }
 0x217   :  { %v124_v46 = vsel %vm36_vm0, %v123_v45, 0.0 }
 0x218   :  { %125 = vadd.xlane.f32.xlu1 %v124_v46  ;;  %v33_v46 = vld [vmem:[%s508_s3 + $0x8] sm:$0x3f]  ;;  %s369_s3 = smov 16  }
 0x219   :  { %v243_v48 = vperm.slane %v33_v46, 0  ;;  %v245_v51 = vperm.slane %v33_v46, 1 }
 0x28b   :  { %v126_v54 = vpop.xlane.xlu1 %125 }
 0x28c   :  { %v134_v55 = vmul.f32 %v434_v53, %v126_v54  ;;  %v247_v54 = vperm.slane %v33_v46, 2 }
 0x28e   :  { %v135_v56 = vsub.f32 %v123_v45, %v134_v55 }
 0x290   :  { %v136_v57 = vmul.f32 %v135_v56, %v135_v56 }
 0x292   :  { %v137_v58 = vsel %vm36_vm0, %v136_v57, 0.0 }
 0x293   :  { %138 = vadd.xlane.f32.xlu1 %v137_v58 }
 0x306   :  { %v139_v61 = vpop.xlane.xlu1 %138 }
 0x307   :  { %v140_v62 = vmul.f32 %v139_v61, %v434_v53 }
 0x309   :  { %v141_v63 = vadd.f32 1e-05, %v140_v62 }
 0x30b   :  { %358 = vrsqrt.f32 %v141_v63  ;;  %vm148_vm10 = vweird.f32 %v141_v63 }
 0x311   :  { %v359_v0 = vpop.eup %358 }
 0x312   :  { %v143_v1 = vmul.f32 %v359_v0, %v141_v63  ;;  %vm149_vm9 = vweird.f32 %v359_v0 }
 0x313   :  { %vm150_vm11 = vmor %vm148_vm10, %vm149_vm9 }
 0x314   :  { %v144_v2 = vmul.f32 %v359_v0, %v143_v1  ;;  %v31_v1 = vld [vmem:[%s506_s2 + $0x70] sm:$0xff] }
 0x315   :  { %316 = vmatpush.msrb.mxu0 %v31_v1 }
 0x316   :  { %v145_v4 = vmul.f32 0.5, %v144_v2  ;;  %v30_v2 = vld [vmem:[%s506_s2 + $0x68] sm:$0xff] }
 0x317   :  { %317 = vmatpush.msrb.mxu0 %v30_v2 }
 0x318   :  { %v146_v5 = vsub.f32 1.5, %v145_v4  ;;  %v29_v4 = vld [vmem:[%s506_s2 + $0x60] sm:$0xff] }
 0x319   :  { %318 = vmatpush.msrb.mxu0 %v29_v4 }
 0x31a   :  { %v147_v6 = vmul.f32 %v359_v0, %v146_v5  ;;  %v28_v5 = vld [vmem:[%s506_s2 + $0x58] sm:$0xff] }
 0x31b   :  { %319 = vmatpush.msrb.mxu0 %v28_v5 }
 0x31c   :  { %v151_v8 = vsel %vm150_vm11, %v359_v0, %v147_v6 }
 0x31d   :  { %v152_v9 = vmul.f32 %v151_v8, %v135_v56 }
 0x31f   :  { %v154_v11 = vmul.f32 %v153_v7, %v152_v9 }
 0x321   :  { %v156_v12 = vadd.f32 %v155_v10, %v154_v11 }
 0x323   :  { %343 = vmatmul.msk.f32.vlgmr.msra.gmra.mxu2 %vm36_vm0, %v156_v12 }
 0x3a6   :  { %v178_v14 = vpop.f32.mrf.mxu2 }
 0x3a7   :  { %v449_v15 = vadd.f32 %v178_v14, %v157_v13 }
 0x3a9   :  { %v344_v17 = vclamps-f32 %v449_v15, 10.0 }
 0x3ab   :  { %v184_v18 = vmul.f32 0.5, %v344_v17 }
 0x3ad   :  { %v185_v19 = vmul.f32 1.442695, %v184_v18 }
 0x3af   :  { %360 = vpow2.f32 %v185_v19  ;;  %v298_v19 = vperm.slane %v33_v46, 4 }
 0x3b5   :  { %v361_v20 = vpop.eup %360 }
 0x3b6   :  { %188 = vrot.lane.b32.xlu2 %v361_v20, %s368_s8 }
 0x410   :  { %v189_v23 = vpop.permute.xlu2 %188 }
 0x411   :  { %v191_v24 = vmul.f32 %v189_v23, %v183_v22 }
 0x413   :  { %v192_v25 = vadd.f32 %v191_v24, %v449_v15 }
 0x415   :  { %345 = vmatmul.msk.f32.vlgmr.msra.gmra.mxu3 %vm194_vm12, %v192_v25 }
 0x498   :  { %v215_v27 = vpop.f32.mrf.mxu3 }
 0x499   :  { %v216_v28 = vadd.f32 %v215_v27, %v193_v26 }
 0x49b   :  { %v219_v29 = vmul.f32 0.01, %v216_v28  ;;  %vm218_vm13 = vcmp.ge.f32.partialorder %v216_v28, 0.0 }
 0x49d   :  { %v220_v30 = vsel %vm218_vm13, %v216_v28, %v219_v29 }
 0x49e   :  { %v221_v31 = vsel %vm36_vm0, %v220_v30, 0.0 }
 0x49f   :  { %222 = vadd.xlane.f32.xlu2 %v221_v31 }
 0x512   :  { %v223_v32 = vpop.xlane.xlu2 %222 }
 0x513   :  { %v224_v33 = vmul.f32 %v223_v32, %v434_v53 }
 0x515   :  { %v225_v34 = vsub.f32 %v220_v30, %v224_v33 }
 0x517   :  { %v226_v35 = vmul.f32 %v225_v34, %v225_v34 }
 0x519   :  { %v227_v36 = vsel %vm36_vm0, %v226_v35, 0.0 }
 0x51a   :  { %228 = vadd.xlane.f32.xlu0 %v227_v36 }
 0x58d   :  { %v229_v38 = vpop.xlane.xlu0 %228 }
 0x58e   :  { %v230_v39 = vmul.f32 %v229_v38, %v434_v53 }
 0x590   :  { %v231_v40 = vadd.f32 1e-05, %v230_v39 }
 0x592   :  { %362 = vrsqrt.f32 %v231_v40  ;;  %vm238_vm15 = vweird.f32 %v231_v40 }
 0x598   :  { %v363_v41 = vpop.eup %362 }
 0x599   :  { %v233_v42 = vmul.f32 %v363_v41, %v231_v40  ;;  %vm239_vm14 = vweird.f32 %v363_v41 }
 0x59a   :  { %vm240_vm1 = vmor %vm238_vm15, %vm239_vm14 }
 0x59b   :  { %v234_v43 = vmul.f32 %v363_v41, %v233_v42 }
 0x59d   :  { %v235_v44 = vmul.f32 0.5, %v234_v43 }
 0x59f   :  { %v236_v45 = vsub.f32 1.5, %v235_v44 }
 0x5a1   :  { %v237_v47 = vmul.f32 %v363_v41, %v236_v45 }
 0x5a3   :  { %v241_v49 = vsel %vm240_vm1, %v363_v41, %v237_v47 }
 0x5a4   :  { %v242_v50 = vmul.f32 %v241_v49, %v225_v34 }
 0x5a6   :  { %v244_v52 = vmul.f32 %v243_v48, %v242_v50 }
 0x5a8   :  { %v246_v53 = vadd.f32 %v245_v51, %v244_v52 }
 0x5aa   :  { %346 = vmatmul.msk.f32.vlgmr.msrb.gmra.mxu3 %vm36_vm0, %v246_v53 }
 0x62d   :  { %v268_v55 = vpop.f32.mrf.mxu3 }
 0x62e   :  { %v269_v56 = vadd.f32 %v268_v55, %v247_v54 }
 0x630   :  { %v272_v57 = vmul.f32 0.01, %v269_v56  ;;  %vm271_vm3 = vcmp.ge.f32.partialorder %v269_v56, 0.0 }
 0x632   :  { %v273_v58 = vsel %vm271_vm3, %v269_v56, %v272_v57 }
 0x633   :  { %v274_v59 = vsel %vm63_vm2, %v273_v58, 0.0 }
 0x634   :  { %275 = vadd.xlane.f32.xlu1 %v274_v59 }
 0x64d   :  { %326 = vrot.lane.b32.xlu1 %v449_v15, %s369_s3  ;;  %v296_v15 = vperm.slane %v33_v46, 3 }
 0x6a7   :  { %v276_v60 = vpop.xlane.xlu1 %275 }
 0x6a8   :  { %v277_v61 = vmul.f32 %v276_v60, %v412_v16 }
 0x6aa   :  { %v278_v62 = vsub.f32 %v273_v58, %v277_v61 }
 0x6ac   :  { %v279_v63 = vmul.f32 %v278_v62, %v278_v62 }
 0x6ae   :  { %v280_v0 = vsel %vm63_vm2, %v279_v63, 0.0 }
 0x6af   :  { %281 = vadd.xlane.f32.xlu0 %v280_v0 }
 0x6bf   :  { %v327_v24 = vpop.permute.xlu1 %326 }
 0x6c3   :  { %332 = vrot.lane.b32.xlu0 %v344_v17, %s369_s3 }
 0x722   :  { %v282_v6 = vpop.xlane.xlu0 %281 }
 0x723   :  { %v283_v7 = vmul.f32 %v282_v6, %v412_v16  ;;  %v300_v16 = vperm.slane %v33_v46, 5 }
 0x725   :  { %v284_v8 = vadd.f32 1e-05, %v283_v7 }
 0x727   :  { %364 = vrsqrt.f32 %v284_v8  ;;  %vm291_vm5 = vweird.f32 %v284_v8 }
 0x72d   :  { %v365_v9 = vpop.eup %364 }
 0x72e   :  { %v286_v10 = vmul.f32 %v365_v9, %v284_v8  ;;  %vm292_vm4 = vweird.f32 %v365_v9 }
 0x72f   :  { %vm293_vm6 = vmor %vm291_vm5, %vm292_vm4 }
 0x730   :  { %v287_v11 = vmul.f32 %v365_v9, %v286_v10 }
 0x732   :  { %v288_v12 = vmul.f32 0.5, %v287_v11 }
 0x734   :  { %v289_v13 = vsub.f32 1.5, %v288_v12 }
 0x735   :  { %v333_v25 = vpop.permute.xlu0 %332 }
 0x736   :  { %v290_v14 = vmul.f32 %v365_v9, %v289_v13 }
 0x738   :  { %v294_v17 = vsel %vm293_vm6, %v365_v9, %v290_v14 }
 0x739   :  { %v295_v18 = vmul.f32 %v294_v17, %v278_v62 }
 0x73b   :  { %v297_v20 = vmul.f32 %v296_v15, %v295_v18 }
 0x73d   :  { %v299_v21 = vadd.f32 %v298_v19, %v297_v20 }
 0x73f   :  { %347 = vmatmul.msk.f32.vlgmr.msrb.gmra.mxu0 %vm63_vm2, %v299_v21 }
 0x7bc   :  { %v321_v22 = vpop.f32.mrf.mxu0 }
 0x7bd   :  { %v322_v23 = vadd.f32 %v321_v22, %v300_v16 }
 0x7bf   :  { %324 = vst.msk [vmem:[%s510_s4] sm:$0xff] %vm36_vm0, %v322_v23 }
 0x7c0   :  { %330 = vst.msk [vmem:[%s510_s4] sm:$0xff] %vm329_vm7, %v327_v24 }
 0x7c1   :  { %336 = vst.msk [vmem:[%s510_s4] sm:$0xff] %vm335_vm8, %v333_v25 }

</bundles_post_ra>
